<compile_context>
chip_gen: v6e
topology: v6e:2x2x1
jax: 0.10.0
libtpu: 0.0.40
codegen_flags: <defaults>
</compile_context>

<pallas_src>
import jax
import jax.numpy as jnp
from jax.experimental import pallas as pl
from jax.experimental.pallas import tpu as pltpu


def _round_up(n, m):
    return ((n + m - 1) // m) * m


def _vmem_capacity_bytes():
    # Per-generation VMEM (v5e/v6e: 128 MiB, v7x: 64 MiB per TC). Conservative
    # fallback (v7x figure) if the query is unavailable.
    try:
        return int(pltpu.get_tpu_info().vmem_capacity_bytes)
    except Exception:
        return 64 << 20


def _mlp_kernel(x_ref, w1_ref, b1_ref, w2_ref, b2_ref, o_ref):
    """One (batch-tile, hidden-tile) step of Linear -> ReLU -> Linear."""
    h_idx = pl.program_id(1)

    # Layer 1 slice: bf16 MXU matmul with f32 accumulate; bias + ReLU in f32.
    h = jnp.dot(x_ref[...].astype(jnp.bfloat16), w1_ref[...],
                preferred_element_type=jnp.float32)
    h = jnp.maximum(h + b1_ref[...], 0.0)

    # Layer 2 partial product over this hidden slice (bf16 operands, f32 acc).
    y = jnp.dot(h.astype(jnp.bfloat16), w2_ref[...],
                preferred_element_type=jnp.float32)

    # Output block index is constant along the hidden axis, so o_ref stays
    # VMEM-resident across hidden tiles and doubles as the f32 accumulator.
    @pl.when(h_idx == 0)
    def _():
        o_ref[...] = y + b2_ref[...]

    @pl.when(h_idx != 0)
    def _():
        o_ref[...] += y


def _select_batch_tile(B, batch_tile):
    """Batch tile: as large as requested (mult. of 8); >=2 tiles for v7x megacore
    as long as each tile still fills the 256-wide MXU M dim (v6e/v7x)."""
    TB = min(batch_tile, _round_up(B, 8))
    half = _round_up(-(-B // 2), 8)
    if _round_up(B, TB) // TB < 2 and half >= 256:
        TB = half
    return TB


def _select_hidden_tile(D_in, H, D_out, TB, budget_bytes):
    """Largest hidden tile (multiple of 128) whose VMEM footprint fits.
    Returns (hidden_tile, padded_hidden_dim)."""
    H_full = _round_up(H, 128)

    def footprint(th, nbuf_w):
        # weight blocks (bf16) + b1 slice, with nbuf_w buffers each
        w = nbuf_w * ((D_in * th + th * D_out) * 2 + th * 4) + 128 * 4
        # double-buffered f32 x tile + f32 out tile (out is also the accumulator;
        # its last dim pads to 128 lanes in VMEM)
        tiles = 2 * TB * D_in * 4 + 2 * TB * _round_up(D_out, 128) * 4
        # f32 hidden intermediate + its bf16 copy
        interm = TB * th * (4 + 2)
        return w + tiles + interm

    if footprint(H_full, 1) <= budget_bytes:
        return H_full, H_full                       # weights fully VMEM-resident
    th = H_full
    while th > 128:
        th = max((th // 2) // 128 * 128, 128)
        if footprint(th, 2) <= budget_bytes:
            return th, _round_up(H, th)
    raise ValueError(
        "TwoLayerNet tile plan does not fit in VMEM even with a 128-wide hidden "
        "tile; reduce batch_tile or tile D_in as well.")
    # TODO(synk): add a D_in reduction grid axis (and optional fp8 weights on
    # v7x) for models where even a 128-wide hidden tile does not fit.


def prepare_two_layer_params(w1, b1, w2, b2, *, hidden_pad):
    """Transpose/cast/pad the weights ONCE (cache across repeated forward calls).

    PyTorch nn.Linear layout in:  w1 [H, D_in], b1 [H], w2 [D_out, H], b2 [D_out].
    Out: w1_t [D_in, H_pad] bf16, b1 [1, H_pad] f32, w2_t [H_pad, D_out] bf16,
         b2 [1, D_out] f32.  Zero padding of H is mathematically exact.
    """
    H, D_in = w1.shape
    D_out = w2.shape[0]
    H_p = hidden_pad
    w1_t = jnp.zeros((D_in, H_p), jnp.bfloat16).at[:, :H].set(
        w1.T.astype(jnp.bfloat16))
    b1_p = jnp.zeros((1, H_p), jnp.float32).at[0, :H].set(b1.astype(jnp.float32))
    w2_t = jnp.zeros((H_p, D_out), jnp.bfloat16).at[:H, :].set(
        w2.T.astype(jnp.bfloat16))
    b2_p = b2.astype(jnp.float32).reshape(1, D_out)
    return w1_t, b1_p, w2_t, b2_p


def two_layer_net_forward(x, params, *, hidden_tile, batch_tile=512):
    """Fused Linear -> ReLU -> Linear on pre-prepared params.  x: [B, D_in] f32."""
    w1_t, b1_p, w2_t, b2_p = params
    B, D_in = x.shape
    H_pad = w1_t.shape[1]
    D_out = w2_t.shape[1]
    TH = hidden_tile
    assert H_pad % TH == 0
    num_h = H_pad // TH

    TB = _select_batch_tile(B, batch_tile)
    B_p = _round_up(B, TB)
    num_b = B_p // TB
    x_in = x if B_p == B else jnp.pad(x, ((0, B_p - B), (0, 0)))

    # VMEM budget: real footprint (not double-counted), capped per generation.
    cap = _vmem_capacity_bytes()
    usable = max(cap - (16 << 20), 32 << 20)        # headroom for Mosaic scratch
    nbuf_w = 1 if num_h == 1 else 2
    need = (nbuf_w * ((D_in * TH + TH * D_out) * 2 + TH * 4)
            + 2 * TB * D_in * 4 + 2 * TB * _round_up(D_out, 128) * 4
            + TB * TH * 6 + (4 << 20))
    vmem_limit = int(min(max(need, 32 << 20), usable))

    # Weights/biases: constant index maps when num_h == 1 -> single-buffer them.
    resident = (num_h == 1)

    def wspec(shape, idx):
        if resident:
            return pl.BlockSpec(shape, idx, pipeline_mode=pl.Buffered(1))
        return pl.BlockSpec(shape, idx)

    in_specs = [
        # x: f32 straight from HBM (cast to bf16 in-kernel); full-extent last dim.
        pl.BlockSpec((TB, D_in), lambda i, h: (i, 0)),
        wspec((D_in, TH), lambda i, h: (0, h)),
        wspec((1, TH), lambda i, h: (0, h)),
        wspec((TH, D_out), lambda i, h: (h, 0)),
        pl.BlockSpec((1, D_out), lambda i, h: (0, 0), pipeline_mode=pl.Buffered(1)),
    ]
    out_spec = pl.BlockSpec((TB, D_out), lambda i, h: (i, 0))

    flops = 2 * B_p * (D_in * H_pad + H_pad * D_out)
    bytes_accessed = int(x_in.size * 4 + w1_t.size * 2 + w2_t.size * 2
                         + b1_p.size * 4 + b2_p.size * 4 + B_p * D_out * 4)

    out = pl.pallas_call(
        _mlp_kernel,
        out_shape=jax.ShapeDtypeStruct((B_p, D_out), jnp.float32),
        grid_spec=pl.GridSpec(
            grid=(num_b, num_h),        # reduction (hidden) axis last
            in_specs=in_specs,
            out_specs=out_spec,
        ),
        compiler_params=pltpu.CompilerParams(
            # batch tiles independent -> shard across v7x's 2 TCs; hidden axis is
            # a reduction into the resident output block -> arbitrary.
            dimension_semantics=("parallel", "arbitrary"),
            vmem_limit_bytes=vmem_limit,
        ),
        cost_estimate=pl.CostEstimate(
            flops=flops, transcendentals=0, bytes_accessed=bytes_accessed),
    )(x_in, w1_t, b1_p, w2_t, b2_p)

    return out if B_p == B else out[:B]


def two_layer_net(x, w1, b1, w2, b2, *, batch_tile=512):
    """Convenience one-shot wrapper (prepares params then runs the kernel).
    For repeated inference, call prepare_two_layer_params once and reuse it."""
    B, D_in = x.shape
    H, D_out = w1.shape[0], w2.shape[0]
    TB = _select_batch_tile(B, batch_tile)
    budget = max(_vmem_capacity_bytes() - (20 << 20), 32 << 20)
    TH, H_pad = _select_hidden_tile(D_in, H, D_out, TB, budget)
    params = prepare_two_layer_params(w1, b1, w2, b2, hidden_pad=H_pad)
    return two_layer_net_forward(x, params, hidden_tile=TH, batch_tile=batch_tile)


if __name__ == "__main__":
    # Small but representative shapes for the MLP forward.
    B, D_in, H, D_out = 256, 32, 64, 16

    key = jax.random.PRNGKey(0)
    kx, kw1, kb1, kw2, kb2 = jax.random.split(key, 5)

    x = jax.random.normal(kx, (B, D_in), dtype=jnp.float32)

    # Deterministic init mimicking nn.Linear's uniform(-1/sqrt(fan_in), 1/sqrt(fan_in)).
    bound1 = 1.0 / jnp.sqrt(jnp.float32(D_in))
    w1 = jax.random.uniform(kw1, (H, D_in), jnp.float32, -bound1, bound1)   # [out, in]
    b1 = jax.random.uniform(kb1, (H,), jnp.float32, -bound1, bound1)
    bound2 = 1.0 / jnp.sqrt(jnp.float32(H))
    w2 = jax.random.uniform(kw2, (D_out, H), jnp.float32, -bound2, bound2)
    b2 = jax.random.uniform(kb2, (D_out,), jnp.float32, -bound2, bound2)

    y = two_layer_net(x, w1, b1, w2, b2)
    y = jax.block_until_ready(y)
    assert y.shape == (B, D_out)

    # Reference 1: same bf16-operand / f32-accumulate math as the kernel (tight tol).
    xb = x.astype(jnp.bfloat16).astype(jnp.float32)
    w1b = w1.astype(jnp.bfloat16).astype(jnp.float32)
    w2b = w2.astype(jnp.bfloat16).astype(jnp.float32)
    h_ref = jnp.maximum(xb @ w1b.T + b1, 0.0)
    h_ref_b = h_ref.astype(jnp.bfloat16).astype(jnp.float32)
    y_ref_bf16 = h_ref_b @ w2b.T + b2
    assert jnp.allclose(y, y_ref_bf16, atol=1e-4, rtol=1e-4)

    # Reference 2: full-precision PyTorch-equivalent forward (loose tol, bf16 operands).
    y_ref_f32 = jnp.maximum(x @ w1.T + b1, 0.0) @ w2.T + b2
    assert jnp.allclose(y, y_ref_f32, atol=5e-2, rtol=5e-2)

    print("KERNEL_OK")
</pallas_src>

<mosaic_0001>
module attributes {stable_mosaic.version = 11 : i64} {
  func.func @_mlp_kernel(%arg0: i32, %arg1: i32, %arg2: memref<256x32xf32, #tpu.memory_space<vmem>>, %arg3: memref<32x128xbf16, #tpu.memory_space<vmem>>, %arg4: memref<1x128xf32, #tpu.memory_space<vmem>>, %arg5: memref<128x16xbf16, #tpu.memory_space<vmem>>, %arg6: memref<1x16xf32, #tpu.memory_space<vmem>>, %arg7: memref<256x16xf32, #tpu.memory_space<vmem>>) attributes {dimension_semantics = [#tpu.dimension_semantics<parallel>, #tpu.dimension_semantics<arbitrary>], iteration_bounds = array<i64: 1, 1>, scalar_prefetch = 0 : i64, scratch_operands = 0 : i64, tpu.core_type = #tpu.core_type<tc>, window_params = [{transform_indices = @transform_0, window_bounds = array<i64: 256, 32>}, {pipeline_mode = #tpu.pipeline_mode<synchronous>, transform_indices = @transform_1, window_bounds = array<i64: 32, 128>}, {pipeline_mode = #tpu.pipeline_mode<synchronous>, transform_indices = @transform_2, window_bounds = array<i64: 1, 128>}, {pipeline_mode = #tpu.pipeline_mode<synchronous>, transform_indices = @transform_3, window_bounds = array<i64: 128, 16>}, {pipeline_mode = #tpu.pipeline_mode<synchronous>, transform_indices = @transform_4, window_bounds = array<i64: 1, 16>}, {transform_indices = @transform_5, window_bounds = array<i64: 256, 16>}]} {
    %c0 = arith.constant 0 : index
    %c0_0 = arith.constant 0 : index
    %0 = vector.load %arg2[%c0, %c0_0] : memref<256x32xf32, #tpu.memory_space<vmem>>, vector<256x32xf32>
    %1 = arith.truncf %0 : vector<256x32xf32> to vector<256x32xbf16>
    %c0_1 = arith.constant 0 : index
    %c0_2 = arith.constant 0 : index
    %2 = vector.load %arg3[%c0_1, %c0_2] : memref<32x128xbf16, #tpu.memory_space<vmem>>, vector<32x128xbf16>
    %cst = arith.constant dense<0.000000e+00> : vector<256x128xf32>
    %3 = tpu.matmul %1, %2, %cst {dimension_numbers = #tpu.dot_dimension_numbers<[1], [0], [0], [1], [0, 0, 1, 1], [], []>} : vector<256x32xbf16>, vector<32x128xbf16>, vector<256x128xf32> -> vector<256x128xf32>
    %c0_3 = arith.constant 0 : index
    %c0_4 = arith.constant 0 : index
    %4 = vector.load %arg4[%c0_3, %c0_4] : memref<1x128xf32, #tpu.memory_space<vmem>>, vector<1x128xf32>
    %5 = vector.broadcast %4 : vector<1x128xf32> to vector<256x128xf32>
    %6 = arith.addf %3, %5 : vector<256x128xf32>
    %cst_5 = arith.constant 0.000000e+00 : f32
    %7 = vector.broadcast %cst_5 : f32 to vector<256x128xf32>
    %8 = arith.maximumf %6, %7 : vector<256x128xf32>
    %9 = arith.truncf %8 : vector<256x128xf32> to vector<256x128xbf16>
    %c0_6 = arith.constant 0 : index
    %c0_7 = arith.constant 0 : index
    %10 = vector.load %arg5[%c0_6, %c0_7] : memref<128x16xbf16, #tpu.memory_space<vmem>>, vector<128x16xbf16>
    %cst_8 = arith.constant dense<0.000000e+00> : vector<256x16xf32>
    %11 = tpu.matmul %9, %10, %cst_8 {dimension_numbers = #tpu.dot_dimension_numbers<[1], [0], [0], [1], [0, 0, 1, 1], [], []>} : vector<256x128xbf16>, vector<128x16xbf16>, vector<256x16xf32> -> vector<256x16xf32>
    %c0_i32 = arith.constant 0 : i32
    %12 = arith.cmpi eq, %arg1, %c0_i32 : i32
    %13 = arith.extui %12 : i1 to i32
    %c0_i32_9 = arith.constant 0 : i32
    %14 = arith.cmpi ne, %13, %c0_i32_9 : i32
    scf.if %14 {
      %c0_12 = arith.constant 0 : index
      %c0_13 = arith.constant 0 : index
      %18 = vector.load %arg6[%c0_12, %c0_13] : memref<1x16xf32, #tpu.memory_space<vmem>>, vector<1x16xf32>
      %19 = vector.broadcast %18 : vector<1x16xf32> to vector<256x16xf32>
      %20 = arith.addf %11, %19 : vector<256x16xf32>
      %c0_14 = arith.constant 0 : index
      %c0_15 = arith.constant 0 : index
      %21 = vector.load %arg7[%c0_14, %c0_15] : memref<256x16xf32, #tpu.memory_space<vmem>>, vector<256x16xf32>
      tpu.vector_store %arg7[%c0_14, %c0_15], %20 {strides = array<i32>} : memref<256x16xf32, #tpu.memory_space<vmem>>, vector<256x16xf32>,
    } else {
    }
    %c0_i32_10 = arith.constant 0 : i32
    %15 = arith.cmpi ne, %arg1, %c0_i32_10 : i32
    %16 = arith.extui %15 : i1 to i32
    %c0_i32_11 = arith.constant 0 : i32
    %17 = arith.cmpi ne, %16, %c0_i32_11 : i32
    scf.if %17 {
      %c0_12 = arith.constant 0 : index
      %c0_13 = arith.constant 0 : index
      %18 = vector.load %arg7[%c0_12, %c0_13] : memref<256x16xf32, #tpu.memory_space<vmem>>, vector<256x16xf32>
      %19 = arith.addf %18, %11 : vector<256x16xf32>
      %c0_14 = arith.constant 0 : index
      %c0_15 = arith.constant 0 : index
      %20 = vector.load %arg7[%c0_14, %c0_15] : memref<256x16xf32, #tpu.memory_space<vmem>>, vector<256x16xf32>
      tpu.vector_store %arg7[%c0_14, %c0_15], %19 {strides = array<i32>} : memref<256x16xf32, #tpu.memory_space<vmem>>, vector<256x16xf32>,
    } else {
    }
    return
  }
  func.func @transform_0(%arg0: i32, %arg1: i32) -> (i32, i32) {
    %c0_i32 = arith.constant 0 : i32
    %c0_i32_0 = arith.constant 0 : i32
    return %arg0, %c0_i32 : i32, i32
  }
  func.func @transform_1(%arg0: i32, %arg1: i32) -> (i32, i32) {
    %c0_i32 = arith.constant 0 : i32
    %c0_i32_0 = arith.constant 0 : i32
    return %c0_i32, %arg1 : i32, i32
  }
  func.func @transform_2(%arg0: i32, %arg1: i32) -> (i32, i32) {
    %c0_i32 = arith.constant 0 : i32
    %c0_i32_0 = arith.constant 0 : i32
    return %c0_i32, %arg1 : i32, i32
  }
  func.func @transform_3(%arg0: i32, %arg1: i32) -> (i32, i32) {
    %c0_i32 = arith.constant 0 : i32
    %c0_i32_0 = arith.constant 0 : i32
    return %arg1, %c0_i32 : i32, i32
  }
  func.func @transform_4(%arg0: i32, %arg1: i32) -> (i32, i32) {
    %c0_i32 = arith.constant 0 : i32
    %c0_i32_0 = arith.constant 0 : i32
    %c0_i32_1 = arith.constant 0 : i32
    return %c0_i32, %c0_i32_0 : i32, i32
  }
  func.func @transform_5(%arg0: i32, %arg1: i32) -> (i32, i32) {
    %c0_i32 = arith.constant 0 : i32
    %c0_i32_0 = arith.constant 0 : i32
    return %arg0, %c0_i32 : i32, i32
  }
}

</mosaic_0001>

<bundles_post_ra>
// kernel: tpu_custom_call.1
= control target key start
LH: loop header
LB: loop body
LE: loop exit
PB: predicated region body
PF: predicated region fallthrough
CT: control target
= control target key end

     0   :  { %vm92_vm0 = vcmask 261120   ;;  %vm618_vm1 = vcmask 130048   ;;  %s1310_s1 = inlined_call_operand.vmem [shape: bf16[32,128], index: 1, kind: input, shape index: {}]   ;;  %s1311_s0 = inlined_call_operand.vmem [shape: f32[256,32], index: 0, kind: input, shape index: {}]   ;;  %s1312_s3 = inlined_call_operand.vmem [shape: bf16[128,16], index: 3, kind: input, shape index: {}]   ;;  %s1313_s2 = inlined_call_operand.vmem [shape: f32[1,128], index: 2, kind: input, shape index: {}]   ;;  %s1314_s4 = inlined_call_operand.vmem [shape: f32[1,16], index: 4, kind: input, shape index: {}]   ;;  %s1315_s5 = inlined_call_operand.vmem [shape: f32[256,16], index: 5, kind: output, shape index: {}]  }
   0x1   :  { %v926_v0 = vld [vmem:[%s1310_s1 + $0x8] sm:$0xff]   ;;  %v927_v1 = vld [vmem:[%s1310_s1] sm:$0xff]   ;;  %v23_v5 = vld [vmem:[%s1311_s0 + $0x10] sm:$0xff] }
   0x2   :  { %826 = vmatprep.subr.bf16.mxu0 %v926_v0  ;;  %v21_v2 = vld [vmem:[%s1311_s0] sm:$0xff]  ;;  %v22_v3 = vld [vmem:[%s1311_s0 + $0x8] sm:$0xff]  ;;  %v24_v6 = vld [vmem:[%s1311_s0 + $0x18] sm:$0xff] }
   0x3   :  { %827 = vmatpush3.bf16.msra.mxu0 %v926_v0  ;;  %v53_v4 = vpack.c.bf16 %v22_v3, %v21_v2  ;;  %v25_v7 = vld [vmem:[%s1311_s0 + $0x20] sm:$0xff]  ;;  %v26_v8 = vld [vmem:[%s1311_s0 + $0x28] sm:$0xff]  ;;  %v54_v9 = vpack.c.bf16 %v24_v6, %v23_v5  ;;  %v27_v11 = vld [vmem:[%s1311_s0 + $0x30] sm:$0xff] }
   0x4   :  { %828 = vmatprep.subr.bf16.mxu0 %v927_v1  ;;  %v55_v10 = vpack.c.bf16 %v26_v8, %v25_v7  ;;  %v28_v12 = vld [vmem:[%s1311_s0 + $0x38] sm:$0xff]  ;;  %v29_v13 = vld [vmem:[%s1311_s0 + $0x40] sm:$0xff]  ;;  %v30_v14 = vld [vmem:[%s1311_s0 + $0x48] sm:$0xff] }
   0x5   :  { %830 = vmatprep.mubr.msk.bf16.mxu0 %vm92_vm0, %v53_v4  ;;  %v928_v15 = vld [vmem:[%s1312_s3 + $0x38] sm:$0xff]   ;;  %v56_v16 = vpack.c.bf16 %v28_v12, %v27_v11  ;;  %v929_v17 = vld [vmem:[%s1312_s3 + $0x30] sm:$0xff]   ;;  %v57_v18 = vpack.c.bf16 %v30_v14, %v29_v13  ;;  %v930_v20 = vld [vmem:[%s1312_s3 + $0x28] sm:$0xff]  }
   0x6   :  { %910 = vmatprep.subr.bf16.mxu1 %v928_v15  ;;  %v31_v19 = vld [vmem:[%s1311_s0 + $0x50] sm:$0xff]  ;;  %v32_v21 = vld [vmem:[%s1311_s0 + $0x58] sm:$0xff]  ;;  %v33_v22 = vld [vmem:[%s1311_s0 + $0x60] sm:$0xff] }
   0x7   :  { %829 = vmatpush3.bf16.msra.mxu0 %v927_v1  ;;  %918 = vmatpush3.bf16.msra.mxu1 %v928_v15  ;;  %v34_v23 = vld [vmem:[%s1311_s0 + $0x68] sm:$0xff]  ;;  %v931_v24 = vld [vmem:[%s1312_s3 + $0x20] sm:$0xff]   ;;  %v58_v25 = vpack.c.bf16 %v32_v21, %v31_v19  ;;  %v932_v27 = vld [vmem:[%s1312_s3 + $0x18] sm:$0xff]  }
   0x8   :  { %862 = vmatprep.subr.bf16.mxu0 %v928_v15  ;;  %911 = vmatprep.subr.bf16.mxu1 %v929_v17  ;;  %v59_v26 = vpack.c.bf16 %v34_v23, %v33_v22  ;;  %v35_v28 = vld [vmem:[%s1311_s0 + $0x70] sm:$0xff]  ;;  %v36_v29 = vld [vmem:[%s1311_s0 + $0x78] sm:$0xff]  ;;  %v37_v30 = vld [vmem:[%s1311_s0 + $0x80] sm:$0xff] }
   0x9   :  { %v38_v31 = vld [vmem:[%s1311_s0 + $0x88] sm:$0xff]  ;;  %v60_v32 = vpack.c.bf16 %v36_v29, %v35_v28  ;;  %v39_v34 = vld [vmem:[%s1311_s0 + $0x90] sm:$0xff]  ;;  %v40_v35 = vld [vmem:[%s1311_s0 + $0x98] sm:$0xff] }
   0xa   :  { %831 = vmatmul.mubr.msk.bf16.vlgmr.msra.gmra.mxu0 %vm92_vm0, %v54_v9  ;;  %v61_v33 = vpack.c.bf16 %v38_v31, %v37_v30  ;;  %v41_v36 = vld [vmem:[%s1311_s0 + $0xa0] sm:$0xff]  ;;  %v42_v37 = vld [vmem:[%s1311_s0 + $0xa8] sm:$0xff]  ;;  %v62_v38 = vpack.c.bf16 %v40_v35, %v39_v34  ;;  %v43_v40 = vld [vmem:[%s1311_s0 + $0xb0] sm:$0xff] }
   0xb   :  { %834 = vmatprep.mubr.msk.bf16.mxu0 %vm92_vm0, %v55_v10  ;;  %863 = vmatpush3.bf16.msra.mxu0 %v928_v15  ;;  %v63_v39 = vpack.c.bf16 %v42_v37, %v41_v36  ;;  %v44_v41 = vld [vmem:[%s1311_s0 + $0xb8] sm:$0xff]  ;;  %v45_v42 = vld [vmem:[%s1311_s0 + $0xc0] sm:$0xff]  ;;  %v46_v43 = vld [vmem:[%s1311_s0 + $0xc8] sm:$0xff] }
   0xc   :  { %864 = vmatprep.subr.bf16.mxu0 %v929_v17  ;;  %919 = vmatpush3.bf16.msra.mxu1 %v929_v17  ;;  %v64_v44 = vpack.c.bf16 %v44_v41, %v43_v40  ;;  %v65_v45 = vpack.c.bf16 %v46_v43, %v45_v42  ;;  %v47_v46 = vld [vmem:[%s1311_s0 + $0xd0] sm:$0xff]  ;;  %v48_v47 = vld [vmem:[%s1311_s0 + $0xd8] sm:$0xff]  ;;  %v49_v48 = vld [vmem:[%s1311_s0 + $0xe0] sm:$0xff] }
   0xd   :  { %912 = vmatprep.subr.bf16.mxu1 %v930_v20  ;;  %v50_v49 = vld [vmem:[%s1311_s0 + $0xe8] sm:$0xff]  ;;  %v66_v50 = vpack.c.bf16 %v48_v47, %v47_v46  ;;  %v51_v52 = vld [vmem:[%s1311_s0 + $0xf0] sm:$0xff]  ;;  %v52_v53 = vld [vmem:[%s1311_s0 + $0xf8] sm:$0xff] }
   0xe   :  { %v67_v51 = vpack.c.bf16 %v50_v49, %v49_v48  ;;  %v68_v54 = vpack.c.bf16 %v52_v53, %v51_v52  ;;  %v933_v55 = vld [vmem:[%s1312_s3 + $0x10] sm:$0xff]   ;;  %v934_v56 = vld [vmem:[%s1312_s3 + $0x8] sm:$0xff]   ;;  %v935_v57 = vld [vmem:[%s1312_s3] sm:$0xff]  }
   0xf   :  { %865 = vmatpush3.bf16.msra.mxu0 %v929_v17  ;;  %v1111_v60 = vld [vmem:[%s1313_s2] ss:$0 sm:$0xff] }
  0x10   :  { %866 = vmatprep.subr.bf16.mxu0 %v930_v20  ;;  %920 = vmatpush3.bf16.msra.mxu1 %v930_v20 }
  0x11   :  { %913 = vmatprep.subr.bf16.mxu1 %v931_v24 }
  0x12   :  { %835 = vmatmul.mubr.msk.bf16.gmra.mxu0 %vm92_vm0, %v56_v16 }
  0x13   :  { %838 = vmatprep.mubr.msk.bf16.mxu0 %vm92_vm0, %v57_v18  ;;  %867 = vmatpush3.bf16.msra.mxu0 %v930_v20 }
  0x14   :  { %868 = vmatprep.subr.bf16.mxu0 %v931_v24  ;;  %921 = vmatpush3.bf16.msra.mxu1 %v931_v24 }
  0x15   :  { %914 = vmatprep.subr.bf16.mxu1 %v932_v27 }
  0x17   :  { %869 = vmatpush3.bf16.msra.mxu0 %v931_v24 }
  0x18   :  { %870 = vmatprep.subr.bf16.mxu0 %v932_v27  ;;  %922 = vmatpush3.bf16.msra.mxu1 %v932_v27 }
  0x19   :  { %915 = vmatprep.subr.bf16.mxu1 %v933_v55 }
  0x1a   :  { %839 = vmatmul.mubr.msk.bf16.gmra.mxu0 %vm92_vm0, %v58_v25 }
  0x1b   :  { %842 = vmatprep.mubr.msk.bf16.mxu0 %vm92_vm0, %v59_v26  ;;  %871 = vmatpush3.bf16.msra.mxu0 %v932_v27 }
  0x1c   :  { %872 = vmatprep.subr.bf16.mxu0 %v933_v55  ;;  %923 = vmatpush3.bf16.msra.mxu1 %v933_v55 }
  0x1d   :  { %916 = vmatprep.subr.bf16.mxu1 %v934_v56 }
  0x1f   :  { %873 = vmatpush3.bf16.msra.mxu0 %v933_v55 }
  0x20   :  { %874 = vmatprep.subr.bf16.mxu0 %v934_v56  ;;  %924 = vmatpush3.bf16.msra.mxu1 %v934_v56 }
  0x21   :  { %917 = vmatprep.subr.bf16.mxu1 %v935_v57 }
  0x22   :  { %843 = vmatmul.mubr.msk.bf16.gmra.mxu0 %vm92_vm0, %v60_v32 }
  0x23   :  { %846 = vmatprep.mubr.msk.bf16.mxu0 %vm92_vm0, %v61_v33  ;;  %875 = vmatpush3.bf16.msra.mxu0 %v934_v56 }
  0x24   :  { %876 = vmatprep.subr.bf16.mxu0 %v935_v57  ;;  %925 = vmatpush3.bf16.msra.mxu1 %v935_v57 }
  0x27   :  { %877 = vmatpush3.bf16.msra.mxu0 %v935_v57 }
  0x2a   :  { %847 = vmatmul.mubr.msk.bf16.gmra.mxu0 %vm92_vm0, %v62_v38 }
  0x2b   :  { %850 = vmatprep.mubr.msk.bf16.mxu0 %vm92_vm0, %v63_v39 }
  0x32   :  { %851 = vmatmul.mubr.msk.bf16.gmra.mxu0 %vm92_vm0, %v64_v44 }
  0x33   :  { %854 = vmatprep.mubr.msk.bf16.mxu0 %vm92_vm0, %v65_v45 }
  0x3a   :  { %855 = vmatmul.mubr.msk.bf16.gmra.mxu0 %vm92_vm0, %v66_v50 }
  0x3b   :  { %858 = vmatprep.mubr.msk.bf16.mxu0 %vm92_vm0, %v67_v51 }
  0x42   :  { %859 = vmatmul.mubr.msk.bf16.gmra.mxu0 %vm92_vm0, %v68_v54 }
  0xca   :  { %v832_v58 = vpop.f32.mrf.mxu0 }
  0xcb   :  { %v184_v0 = vadd.f32 %v832_v58, %v1111_v60 }
  0xcc   :  { %v175_v59 = vpop.f32.mrf.mxu0 }
  0xcd   :  { %v176_v62 = vadd.f32 %v1111_v60, %v175_v59  ;;  %v304_v7 = vmax.f32 %v184_v0, 0.0 }
  0xce   :  { %v833_v61 = vpop.f32.mrf.mxu0 }
  0xcf   :  { %v187_v63 = vadd.f32 %v833_v61, %v1111_v60  ;;  %v302_v5 = vmax.f32 %v176_v62, 0.0 }
  0xd0   :  { %v178_v1 = vpop.f32.mrf.mxu0 }
  0xd1   :  { %v179_v2 = vadd.f32 %v1111_v60, %v178_v1  ;;  %v305_v3 = vmax.f32 %v187_v63, 0.0 }
  0xd2   :  { %v836_v4 = vpop.f32.mrf.mxu0 }
  0xd3   :  { %v303_v6 = vmax.f32 %v179_v2, 0.0  ;;  %v335_v10 = vpack.c.bf16 %v305_v3, %v304_v7  ;;  %v200_v14 = vadd.f32 %v836_v4, %v1111_v60 }
  0xd4   :  { %v191_v8 = vpop.f32.mrf.mxu0 }
  0xd5   :  { %v334_v9 = vpack.c.bf16 %v303_v6, %v302_v5  ;;  %v192_v12 = vadd.f32 %v1111_v60, %v191_v8  ;;  %v308_v21 = vmax.f32 %v200_v14, 0.0 }
  0xd6   :  { %v837_v11 = vpop.f32.mrf.mxu0 }
  0xd7   :  { %v203_v13 = vadd.f32 %v837_v11, %v1111_v60  ;;  %878 = vmatprep.mubr.bf16.mxu0 %v334_v9  ;;  %v306_v19 = vmax.f32 %v192_v12, 0.0 }
  0xd8   :  { %v194_v15 = vpop.f32.mrf.mxu0  ;;  %879 = vmatmul.mubr.bf16.vlgmr.msra.gmra.mxu0 %v335_v10 }
  0xd9   :  { %v195_v16 = vadd.f32 %v1111_v60, %v194_v15  ;;  %v309_v17 = vmax.f32 %v203_v13, 0.0 }
  0xda   :  { %v840_v18 = vpop.f32.mrf.mxu0 }
  0xdb   :  { %v307_v20 = vmax.f32 %v195_v16, 0.0  ;;  %v337_v24 = vpack.c.bf16 %v309_v17, %v308_v21  ;;  %v216_v28 = vadd.f32 %v840_v18, %v1111_v60 }
  0xdc   :  { %v207_v22 = vpop.f32.mrf.mxu0 }
  0xdd   :  { %v336_v23 = vpack.c.bf16 %v307_v20, %v306_v19  ;;  %v208_v26 = vadd.f32 %v1111_v60, %v207_v22  ;;  %v312_v35 = vmax.f32 %v216_v28, 0.0 }
  0xde   :  { %v841_v25 = vpop.f32.mrf.mxu0 }
  0xdf   :  { %v219_v27 = vadd.f32 %v841_v25, %v1111_v60  ;;  %882 = vmatprep.mubr.bf16.mxu1 %v336_v23  ;;  %v310_v33 = vmax.f32 %v208_v26, 0.0 }
  0xe0   :  { %v210_v29 = vpop.f32.mrf.mxu0  ;;  %883 = vmatmul.mubr.bf16.vlgmr.msra.gmra.mxu1 %v337_v24 }
  0xe1   :  { %v211_v30 = vadd.f32 %v1111_v60, %v210_v29  ;;  %v313_v31 = vmax.f32 %v219_v27, 0.0 }
  0xe2   :  { %v844_v32 = vpop.f32.mrf.mxu0 }
  0xe3   :  { %v311_v34 = vmax.f32 %v211_v30, 0.0  ;;  %v339_v38 = vpack.c.bf16 %v313_v31, %v312_v35  ;;  %v232_v42 = vadd.f32 %v844_v32, %v1111_v60 }
  0xe4   :  { %v223_v36 = vpop.f32.mrf.mxu0 }
  0xe5   :  { %v338_v37 = vpack.c.bf16 %v311_v34, %v310_v33  ;;  %v224_v40 = vadd.f32 %v1111_v60, %v223_v36  ;;  %v316_v49 = vmax.f32 %v232_v42, 0.0 }
  0xe6   :  { %v845_v39 = vpop.f32.mrf.mxu0 }
  0xe7   :  { %v235_v41 = vadd.f32 %v845_v39, %v1111_v60  ;;  %886 = vmatprep.mubr.bf16.mxu1 %v338_v37  ;;  %v314_v47 = vmax.f32 %v224_v40, 0.0 }
  0xe8   :  { %v226_v43 = vpop.f32.mrf.mxu0  ;;  %887 = vmatmul.mubr.bf16.gmra.mxu1 %v339_v38 }
  0xe9   :  { %v227_v44 = vadd.f32 %v1111_v60, %v226_v43  ;;  %v317_v45 = vmax.f32 %v235_v41, 0.0 }
  0xea   :  { %v848_v46 = vpop.f32.mrf.mxu0 }
  0xeb   :  { %v315_v48 = vmax.f32 %v227_v44, 0.0  ;;  %v341_v52 = vpack.c.bf16 %v317_v45, %v316_v49  ;;  %v248_v56 = vadd.f32 %v848_v46, %v1111_v60  ;;  %v1148_v44 = vld [vmem:[%s1314_s4] ss:$0 sm:$0xff] }
  0xec   :  { %v239_v50 = vpop.f32.mrf.mxu0 }
  0xed   :  { %v340_v51 = vpack.c.bf16 %v315_v48, %v314_v47  ;;  %v240_v54 = vadd.f32 %v1111_v60, %v239_v50  ;;  %v320_v0 = vmax.f32 %v248_v56, 0.0 }
  0xee   :  { %v849_v53 = vpop.f32.mrf.mxu0 }
  0xef   :  { %v251_v55 = vadd.f32 %v849_v53, %v1111_v60  ;;  %890 = vmatprep.mubr.bf16.mxu1 %v340_v51  ;;  %v318_v62 = vmax.f32 %v240_v54, 0.0 }
  0xf0   :  { %v242_v57 = vpop.f32.mrf.mxu0  ;;  %891 = vmatmul.mubr.bf16.gmra.mxu1 %v341_v52 }
  0xf1   :  { %v243_v58 = vadd.f32 %v1111_v60, %v242_v57  ;;  %v321_v59 = vmax.f32 %v251_v55, 0.0 }
  0xf2   :  { %v852_v61 = vpop.f32.mrf.mxu0 }
  0xf3   :  { %v319_v63 = vmax.f32 %v243_v58, 0.0  ;;  %v343_v3 = vpack.c.bf16 %v321_v59, %v320_v0  ;;  %v264_v7 = vadd.f32 %v852_v61, %v1111_v60 }
  0xf4   :  { %v255_v1 = vpop.f32.mrf.mxu0 }
  0xf5   :  { %v342_v2 = vpack.c.bf16 %v319_v63, %v318_v62  ;;  %v256_v5 = vadd.f32 %v1111_v60, %v255_v1  ;;  %v324_v14 = vmax.f32 %v264_v7, 0.0 }
  0xf6   :  { %v853_v4 = vpop.f32.mrf.mxu0 }
  0xf7   :  { %v267_v6 = vadd.f32 %v853_v4, %v1111_v60  ;;  %894 = vmatprep.mubr.bf16.mxu1 %v342_v2  ;;  %v322_v12 = vmax.f32 %v256_v5, 0.0 }
  0xf8   :  { %v258_v8 = vpop.f32.mrf.mxu0  ;;  %895 = vmatmul.mubr.bf16.gmra.mxu1 %v343_v3 }
  0xf9   :  { %v259_v9 = vadd.f32 %v1111_v60, %v258_v8  ;;  %v325_v10 = vmax.f32 %v267_v6, 0.0 }
  0xfa   :  { %v856_v11 = vpop.f32.mrf.mxu0 }
  0xfb   :  { %v323_v13 = vmax.f32 %v259_v9, 0.0  ;;  %v345_v17 = vpack.c.bf16 %v325_v10, %v324_v14  ;;  %v280_v21 = vadd.f32 %v856_v11, %v1111_v60 }
  0xfc   :  { %v271_v15 = vpop.f32.mrf.mxu0 }
  0xfd   :  { %v344_v16 = vpack.c.bf16 %v323_v13, %v322_v12  ;;  %v272_v19 = vadd.f32 %v1111_v60, %v271_v15  ;;  %v328_v28 = vmax.f32 %v280_v21, 0.0 }
  0xfe   :  { %v857_v18 = vpop.f32.mrf.mxu0 }
  0xff   :  { %v283_v20 = vadd.f32 %v857_v18, %v1111_v60  ;;  %898 = vmatprep.mubr.bf16.mxu1 %v344_v16  ;;  %v326_v26 = vmax.f32 %v272_v19, 0.0 }
 0x100   :  { %v274_v22 = vpop.f32.mrf.mxu0  ;;  %899 = vmatmul.mubr.bf16.gmra.mxu1 %v345_v17 }
 0x101   :  { %v275_v23 = vadd.f32 %v1111_v60, %v274_v22  ;;  %v329_v24 = vmax.f32 %v283_v20, 0.0 }
 0x102   :  { %v860_v25 = vpop.f32.mrf.mxu0 }
 0x103   :  { %v327_v27 = vmax.f32 %v275_v23, 0.0  ;;  %v347_v31 = vpack.c.bf16 %v329_v24, %v328_v28  ;;  %v296_v35 = vadd.f32 %v860_v25, %v1111_v60 }
 0x104   :  { %v287_v29 = vpop.f32.mrf.mxu0 }
 0x105   :  { %v346_v30 = vpack.c.bf16 %v327_v27, %v326_v26  ;;  %v288_v33 = vadd.f32 %v1111_v60, %v287_v29  ;;  %v332_v41 = vmax.f32 %v296_v35, 0.0 }
 0x106   :  { %v861_v32 = vpop.f32.mrf.mxu0 }
 0x107   :  { %v299_v34 = vadd.f32 %v861_v32, %v1111_v60  ;;  %902 = vmatprep.mubr.bf16.mxu1 %v346_v30  ;;  %v330_v39 = vmax.f32 %v288_v33, 0.0 }
 0x108   :  { %v290_v36 = vpop.f32.mrf.mxu0  ;;  %903 = vmatmul.mubr.bf16.gmra.mxu1 %v347_v31 }
 0x109   :  { %v291_v37 = vadd.f32 %v1111_v60, %v290_v36  ;;  %v333_v38 = vmax.f32 %v299_v34, 0.0 }
 0x10b   :  { %v331_v40 = vmax.f32 %v291_v37, 0.0  ;;  %v349_v43 = vpack.c.bf16 %v333_v38, %v332_v41 }
 0x10d   :  { %v348_v42 = vpack.c.bf16 %v331_v40, %v330_v39 }
 0x10f   :  { %906 = vmatprep.mubr.bf16.mxu1 %v348_v42 }
 0x110   :  { %907 = vmatmul.mubr.bf16.gmra.mxu1 %v349_v43 }
 0x198   :  { %v880_v45 = vpop.f32.mrf.mxu0 }
 0x199   :  { %v588_v46 = vadd.f32 %v880_v45, %v1148_v44 }
 0x19a   :  { %v448_v47 = vpop.f32.mrf.mxu0 }
 0x19b   :  { %621 = vst.msk [vmem:[%s1315_s5 + $0x10] sm:$0xff] %vm618_vm1, %v588_v46  ;;  %v586_v60 = vadd.f32 %v1148_v44, %v448_v47 }
 0x19c   :  { %v881_v48 = vpop.f32.mrf.mxu0 }
 0x19d   :  { %619 = vst.msk [vmem:[%s1315_s5] sm:$0xff] %vm618_vm1, %v586_v60  ;;  %v589_v49 = vadd.f32 %v881_v48, %v1148_v44 }
 0x19e   :  { %v451_v50 = vpop.f32.mrf.mxu0 }
 0x19f   :  { %622 = vst.msk [vmem:[%s1315_s5 + $0x18] sm:$0xff] %vm618_vm1, %v589_v49  ;;  %v587_v51 = vadd.f32 %v1148_v44, %v451_v50 }
 0x1a0   :  { %v884_v52 = vpop.f32.mrf.mxu1 }
 0x1a1   :  { %620 = vst.msk [vmem:[%s1315_s5 + $0x8] sm:$0xff] %vm618_vm1, %v587_v51  ;;  %v592_v53 = vadd.f32 %v884_v52, %v1148_v44 }
 0x1a2   :  { %v464_v54 = vpop.f32.mrf.mxu1 }
 0x1a3   :  { %625 = vst.msk [vmem:[%s1315_s5 + $0x30] sm:$0xff] %vm618_vm1, %v592_v53  ;;  %v590_v55 = vadd.f32 %v1148_v44, %v464_v54 }
 0x1a4   :  { %v885_v56 = vpop.f32.mrf.mxu1 }
 0x1a5   :  { %623 = vst.msk [vmem:[%s1315_s5 + $0x20] sm:$0xff] %vm618_vm1, %v590_v55  ;;  %v593_v57 = vadd.f32 %v885_v56, %v1148_v44 }
 0x1a6   :  { %v467_v58 = vpop.f32.mrf.mxu1 }
 0x1a7   :  { %626 = vst.msk [vmem:[%s1315_s5 + $0x38] sm:$0xff] %vm618_vm1, %v593_v57  ;;  %v591_v59 = vadd.f32 %v1148_v44, %v467_v58 }
 0x1a8   :  { %v888_v61 = vpop.f32.mrf.mxu1 }
 0x1a9   :  { %624 = vst.msk [vmem:[%s1315_s5 + $0x28] sm:$0xff] %vm618_vm1, %v591_v59  ;;  %v596_v62 = vadd.f32 %v888_v61, %v1148_v44 }
 0x1aa   :  { %v480_v63 = vpop.f32.mrf.mxu1 }
 0x1ab   :  { %629 = vst.msk [vmem:[%s1315_s5 + $0x50] sm:$0xff] %vm618_vm1, %v596_v62  ;;  %v594_v0 = vadd.f32 %v1148_v44, %v480_v63 }
 0x1ac   :  { %v889_v1 = vpop.f32.mrf.mxu1 }
 0x1ad   :  { %627 = vst.msk [vmem:[%s1315_s5 + $0x40] sm:$0xff] %vm618_vm1, %v594_v0  ;;  %v597_v2 = vadd.f32 %v889_v1, %v1148_v44 }
 0x1ae   :  { %v483_v3 = vpop.f32.mrf.mxu1 }
 0x1af   :  { %630 = vst.msk [vmem:[%s1315_s5 + $0x58] sm:$0xff] %vm618_vm1, %v597_v2  ;;  %v595_v4 = vadd.f32 %v1148_v44, %v483_v3 }
 0x1b0   :  { %v892_v5 = vpop.f32.mrf.mxu1 }
 0x1b1   :  { %628 = vst.msk [vmem:[%s1315_s5 + $0x48] sm:$0xff] %vm618_vm1, %v595_v4  ;;  %v600_v6 = vadd.f32 %v892_v5, %v1148_v44 }
 0x1b2   :  { %v496_v7 = vpop.f32.mrf.mxu1 }
 0x1b3   :  { %633 = vst.msk [vmem:[%s1315_s5 + $0x70] sm:$0xff] %vm618_vm1, %v600_v6  ;;  %v598_v8 = vadd.f32 %v1148_v44, %v496_v7 }
 0x1b4   :  { %v893_v9 = vpop.f32.mrf.mxu1 }
 0x1b5   :  { %631 = vst.msk [vmem:[%s1315_s5 + $0x60] sm:$0xff] %vm618_vm1, %v598_v8  ;;  %v601_v10 = vadd.f32 %v893_v9, %v1148_v44 }
 0x1b6   :  { %v499_v11 = vpop.f32.mrf.mxu1 }
 0x1b7   :  { %634 = vst.msk [vmem:[%s1315_s5 + $0x78] sm:$0xff] %vm618_vm1, %v601_v10  ;;  %v599_v12 = vadd.f32 %v1148_v44, %v499_v11 }
 0x1b8   :  { %v896_v13 = vpop.f32.mrf.mxu1 }
 0x1b9   :  { %632 = vst.msk [vmem:[%s1315_s5 + $0x68] sm:$0xff] %vm618_vm1, %v599_v12  ;;  %v604_v14 = vadd.f32 %v896_v13, %v1148_v44 }
 0x1ba   :  { %v512_v15 = vpop.f32.mrf.mxu1 }
 0x1bb   :  { %637 = vst.msk [vmem:[%s1315_s5 + $0x90] sm:$0xff] %vm618_vm1, %v604_v14  ;;  %v602_v16 = vadd.f32 %v1148_v44, %v512_v15 }
 0x1bc   :  { %v897_v17 = vpop.f32.mrf.mxu1 }
 0x1bd   :  { %635 = vst.msk [vmem:[%s1315_s5 + $0x80] sm:$0xff] %vm618_vm1, %v602_v16  ;;  %v605_v18 = vadd.f32 %v897_v17, %v1148_v44 }
 0x1be   :  { %v515_v19 = vpop.f32.mrf.mxu1 }
 0x1bf   :  { %638 = vst.msk [vmem:[%s1315_s5 + $0x98] sm:$0xff] %vm618_vm1, %v605_v18  ;;  %v603_v20 = vadd.f32 %v1148_v44, %v515_v19 }
 0x1c0   :  { %v900_v21 = vpop.f32.mrf.mxu1 }
 0x1c1   :  { %636 = vst.msk [vmem:[%s1315_s5 + $0x88] sm:$0xff] %vm618_vm1, %v603_v20  ;;  %v608_v22 = vadd.f32 %v900_v21, %v1148_v44 }
 0x1c2   :  { %v528_v23 = vpop.f32.mrf.mxu1 }
 0x1c3   :  { %641 = vst.msk [vmem:[%s1315_s5 + $0xb0] sm:$0xff] %vm618_vm1, %v608_v22  ;;  %v606_v24 = vadd.f32 %v1148_v44, %v528_v23 }
 0x1c4   :  { %v901_v25 = vpop.f32.mrf.mxu1 }
 0x1c5   :  { %639 = vst.msk [vmem:[%s1315_s5 + $0xa0] sm:$0xff] %vm618_vm1, %v606_v24  ;;  %v609_v26 = vadd.f32 %v901_v25, %v1148_v44 }
 0x1c6   :  { %v531_v27 = vpop.f32.mrf.mxu1 }
 0x1c7   :  { %642 = vst.msk [vmem:[%s1315_s5 + $0xb8] sm:$0xff] %vm618_vm1, %v609_v26  ;;  %v607_v28 = vadd.f32 %v1148_v44, %v531_v27 }
 0x1c8   :  { %v904_v29 = vpop.f32.mrf.mxu1 }
 0x1c9   :  { %640 = vst.msk [vmem:[%s1315_s5 + $0xa8] sm:$0xff] %vm618_vm1, %v607_v28  ;;  %v612_v30 = vadd.f32 %v904_v29, %v1148_v44 }
 0x1ca   :  { %v544_v31 = vpop.f32.mrf.mxu1 }
 0x1cb   :  { %645 = vst.msk [vmem:[%s1315_s5 + $0xd0] sm:$0xff] %vm618_vm1, %v612_v30  ;;  %v610_v32 = vadd.f32 %v1148_v44, %v544_v31 }
 0x1cc   :  { %v905_v33 = vpop.f32.mrf.mxu1 }
 0x1cd   :  { %643 = vst.msk [vmem:[%s1315_s5 + $0xc0] sm:$0xff] %vm618_vm1, %v610_v32  ;;  %v613_v34 = vadd.f32 %v905_v33, %v1148_v44 }
 0x1ce   :  { %v547_v35 = vpop.f32.mrf.mxu1 }
 0x1cf   :  { %646 = vst.msk [vmem:[%s1315_s5 + $0xd8] sm:$0xff] %vm618_vm1, %v613_v34  ;;  %v611_v36 = vadd.f32 %v1148_v44, %v547_v35 }
 0x1d0   :  { %v908_v37 = vpop.f32.mrf.mxu1 }
 0x1d1   :  { %644 = vst.msk [vmem:[%s1315_s5 + $0xc8] sm:$0xff] %vm618_vm1, %v611_v36  ;;  %v616_v38 = vadd.f32 %v908_v37, %v1148_v44 }
 0x1d2   :  { %v560_v39 = vpop.f32.mrf.mxu1 }
 0x1d3   :  { %649 = vst.msk [vmem:[%s1315_s5 + $0xf0] sm:$0xff] %vm618_vm1, %v616_v38  ;;  %v614_v40 = vadd.f32 %v1148_v44, %v560_v39 }
 0x1d4   :  { %v909_v41 = vpop.f32.mrf.mxu1 }
 0x1d5   :  { %647 = vst.msk [vmem:[%s1315_s5 + $0xe0] sm:$0xff] %vm618_vm1, %v614_v40  ;;  %v617_v42 = vadd.f32 %v909_v41, %v1148_v44 }
 0x1d6   :  { %v563_v43 = vpop.f32.mrf.mxu1 }
 0x1d7   :  { %650 = vst.msk [vmem:[%s1315_s5 + $0xf8] sm:$0xff] %vm618_vm1, %v617_v42  ;;  %v615_v45 = vadd.f32 %v1148_v44, %v563_v43 }
 0x1d9   :  { %648 = vst.msk [vmem:[%s1315_s5 + $0xe8] sm:$0xff] %vm618_vm1, %v615_v45 }

</bundles_post_ra>
